<compile_context>
chip_gen: v7x
topology: tpu7x:2x2x1
jax: 0.10.0
libtpu: 0.0.40
codegen_flags: <defaults>
</compile_context>

<pallas_src>
import jax
import jax.numpy as jnp
from jax import lax
from jax.experimental import pallas as pl
from jax.experimental.pallas import tpu as pltpu

# WIKITEXT2_TRANSFORMER_CONFIG['bptt'] stand-in (positional table length)
BPTT = 16
EMB = 32

# Bypass Pallas entirely below this output size (pure launch overhead there).
_SMALL_OUTPUT_BYTES = 1 << 20          # 1 MiB
# Target per-block output size; 2x double-buffered stays under every
# generation's default scoped VMEM (v5e 16 MiB, v6e 32 MiB, v7x 32 MiB).
_TARGET_BLOCK_BYTES = 4 << 20          # 4 MiB


def _pos_embed_kernel(pos_row_ref, out_ref):
    # pos_row_ref: (1, S*E)  -- flattened positional rows 0..S-1 (resident)
    # out_ref:     (TN, S*E) -- one batch tile, lane-dense store
    out_ref[...] = jnp.broadcast_to(pos_row_ref[...], out_ref.shape)


def _pick_batch_tile(n_rows, row_bytes, target_block_bytes=_TARGET_BLOCK_BYTES):
    """Batch tile: largest multiple-of-8 row count with block <= target bytes,
    capped at n_rows (tile == full dim is always layout-legal)."""
    rows = max(8, (target_block_bytes // max(row_bytes, 1)) // 8 * 8)
    return min(n_rows, rows)


def positional_embedding(x, pos_tbl, *, force_pallas=False):
    """Forward of PositionalEmbedding: (N, S) ids -> (N, S, E) positions."""
    N, S = x.shape
    P, E = pos_tbl.shape
    assert S <= P, "sequence longer than bptt"

    itemsize = jnp.dtype(pos_tbl.dtype).itemsize
    # Static slice + flatten of the (tiny) table; row-major contiguous, so the
    # reshape is metadata only.
    pos_row = lax.slice(pos_tbl, (0, 0), (S, E)).reshape(1, S * E)

    out_bytes = N * S * E * itemsize
    if out_bytes < _SMALL_OUTPUT_BYTES and not force_pallas:
        # Tiny problem: plain XLA broadcast fuses into the consumer and is
        # strictly faster than a kernel launch.
        return jnp.broadcast_to(pos_row.reshape(1, S, E), (N, S, E))

    row_bytes = S * E * itemsize
    tn = _pick_batch_tile(N, row_bytes)
    grid = (pl.cdiv(N, tn),)

    out2d = pl.pallas_call(
        _pos_embed_kernel,
        out_shape=jax.ShapeDtypeStruct((N, S * E), pos_tbl.dtype),
        grid_spec=pltpu.PrefetchScalarGridSpec(
            num_scalar_prefetch=0,
            grid=grid,
            in_specs=[pl.BlockSpec((1, S * E), lambda i: (0, 0))],
            out_specs=pl.BlockSpec((tn, S * E), lambda i: (i, 0)),
        ),
        compiler_params=pltpu.CompilerParams(
            dimension_semantics=("parallel",)),
        cost_estimate=pl.CostEstimate(
            flops=0,
            transcendentals=0,
            bytes_accessed=out_bytes + S * E * itemsize),
    )(pos_row)

    # Free row-major reshape back to the module's (N, S, E) output layout.
    return out2d.reshape(N, S, E)


if __name__ == "__main__":
    key = jax.random.PRNGKey(0)
    k_src, k_pos = jax.random.split(key, 2)

    # nn.Embedding(bptt, embedding_size) weights ~ N(0, 1)
    pos_tbl = jax.random.normal(k_pos, (BPTT, EMB), jnp.float32)

    # --- Small shape from the module (kernel path forced so it runs once) ---
    N, S = 2, 8
    src = jax.random.randint(k_src, (N, S), 0, 50, dtype=jnp.int32)
    out = positional_embedding(src, pos_tbl, force_pallas=True)
    out = jax.block_until_ready(out)
    ref = jnp.broadcast_to(pos_tbl[:S][None, :, :], (N, S, EMB))
    assert out.shape == (N, S, EMB) and out.dtype == jnp.float32
    assert jnp.array_equal(out, ref), "mismatch vs reference (small)"

    # --- Awkward (non-multiple-of-8) batch: exercises cdiv grid / tile cap ---
    N2, S2 = 1037, 16
    src2 = jnp.zeros((N2, S2), jnp.int32)
    out2 = positional_embedding(src2, pos_tbl, force_pallas=True)
    out2 = jax.block_until_ready(out2)
    ref2 = jnp.broadcast_to(pos_tbl[:S2][None, :, :], (N2, S2, EMB))
    assert jnp.array_equal(out2, ref2), "mismatch vs reference (awkward N)"

    # --- Tiny default path (XLA broadcast bypass) ---
    out3 = jax.block_until_ready(positional_embedding(src, pos_tbl))
    assert jnp.array_equal(out3, ref), "mismatch vs reference (bypass)"

    print("KERNEL_OK")
</pallas_src>

<mosaic_0001>
module attributes {stable_mosaic.version = 11 : i64} {
  func.func @_pos_embed_kernel(%arg0: i32, %arg1: memref<1x256xf32, #tpu.memory_space<vmem>>, %arg2: memref<2x256xf32, #tpu.memory_space<vmem>>) attributes {dimension_semantics = [#tpu.dimension_semantics<parallel>], iteration_bounds = array<i64: 1>, scalar_prefetch = 0 : i64, scratch_operands = 0 : i64, tpu.core_type = #tpu.core_type<tc>, window_params = [{pipeline_mode = #tpu.pipeline_mode<synchronous>, transform_indices = @transform_0, window_bounds = array<i64: 1, 256>}, {transform_indices = @transform_1, window_bounds = array<i64: 2, 256>}]} {
    %c0 = arith.constant 0 : index
    %c0_0 = arith.constant 0 : index
    %0 = vector.load %arg1[%c0, %c0_0] : memref<1x256xf32, #tpu.memory_space<vmem>>, vector<1x256xf32>
    %1 = vector.shape_cast %0 : vector<1x256xf32> to vector<1x256xf32>
    %2 = vector.broadcast %1 : vector<1x256xf32> to vector<2x256xf32>
    %c0_1 = arith.constant 0 : index
    %c0_2 = arith.constant 0 : index
    %3 = vector.load %arg2[%c0_1, %c0_2] : memref<2x256xf32, #tpu.memory_space<vmem>>, vector<2x256xf32>
    tpu.vector_store %arg2[%c0_1, %c0_2], %2 {strides = array<i32>} : memref<2x256xf32, #tpu.memory_space<vmem>>, vector<2x256xf32>,
    return
  }
  func.func @transform_0(%arg0: i32) -> (i32, i32) {
    %c0_i32 = arith.constant 0 : i32
    %c0_i32_0 = arith.constant 0 : i32
    %c0_i32_1 = arith.constant 0 : i32
    return %c0_i32, %c0_i32_0 : i32, i32
  }
  func.func @transform_1(%arg0: i32) -> (i32, i32) {
    %c0_i32 = arith.constant 0 : i32
    %c0_i32_0 = arith.constant 0 : i32
    return %arg0, %c0_i32 : i32, i32
  }
}

</mosaic_0001>

<bundles_post_ra>
// kernel: tpu_custom_call.1
= control target key start
LH: loop header
LB: loop body
LE: loop exit
PB: predicated region body
PF: predicated region fallthrough
CT: control target
= control target key end

     0   :  { %6 = vsyncpa [#allocation3], 0  ;;  %s143_s0 = inlined_call_operand.hbm [shape: f32[1,256], index: 0, kind: input, shape index: {}]   ;;  %s144_s1 = inlined_call_operand.hbm [shape: f32[2,256], index: 1, kind: output, shape index: {}]  }
   0x1   :  { %7 = vsyncpa [#allocation4], 0  ;;  %s107_s6 = smov [#allocation2]   ;;  %s59_s10 = scalar_lea.hbm %s143_s0, 32 }
   0x2   :  { %s14_s7 = sshll.u32 %s107_s6, 4  ;;  %p60_p0 = scmp.ne.s32.totalorder %s143_s0, %s59_s10  ;;  %s15_s7 = int_to_ptr.vmem [resolvable:$true] %s14_s7 }
   0x3   :  { %p63_p1 = scmp.lt.u32.totalorder %s59_s10, %s143_s0 }
   0x5   :  { %p65_p2 = pnand %p63_p1, %p60_p0 }
   0x7   :  { %68 = shalt.err (!%p65_p2)
}
   0x8   :  { %s69_s15 = scalar_lea.vmem %s15_s7, 32  ;;  %p74_p4 = scmp.lt.s32.totalorder %s15_s7, %s15_s7 }
   0x9   :  { %p70_p3 = scmp.ne.s32.totalorder %s15_s7, %s69_s15  ;;  %p75_p5 = scmp.lt.s32.totalorder %s69_s15, %s69_s15 }
   0xb   :  { %p76_p6 = por %p75_p5, %p74_p4 }
   0xd   :  { %p77_p7 = pnand %p76_p6, %p70_p3 }
   0xf   :  { %80 = shalt.err (!%p77_p7)
}
  0x10   :  { %17 = dma.hbm_to_vmem [thread:$0]  %s143_s0, 32, %s15_s7, [#allocation3]  }
  0x11   :  { %103 = dma.done.wait [#allocation3], 32  }
  0x12   :  { %104 = vsyncadd [#allocation3], 4294967264  ;;  %v23_v0 = vlaneseq  ;;  %v21_v4 = vld [vmem:[#allocation2] sm:$0x3]  ;;  %s108_s18 = smov [#allocation5]  }
  0x13   :  { %s47_s19 = sshll.u32 %s108_s18, 4  ;;  %s48_s19 = int_to_ptr.vmem [resolvable:$true] %s47_s19 }
  0x14   :  { %v24_v1 = vshrl.u32 %v23_v0, 7  ;;  %s81_s20 = scalar_lea.vmem %s48_s19, 64  ;;  %p86_p9 = scmp.lt.s32.totalorder %s48_s19, %s48_s19 }
  0x15   :  { %p82_p8 = scmp.ne.s32.totalorder %s48_s19, %s81_s20  ;;  %p87_p10 = scmp.lt.s32.totalorder %s81_s20, %s81_s20 }
  0x16   :  { %v25_v2 = vsub.s32 0, %v24_v1  ;;  %v29_v3 = vsub.s32 1, %v24_v1 }
  0x17   :  { %p88_p11 = por %p87_p10, %p86_p9 }
  0x18   :  { %v26_v5 = vrot.slane %v21_v4, %v25_v2  ;;  %v30_v6 = vrot.slane %v21_v4, %v29_v3 }
  0x19   :  { %p89_p12 = pnand %p88_p11, %p82_p8 }
  0x1a   :  { %v31_v7 = vcombine.low %v26_v5, %v30_v6 }
  0x1c   :  { %56 = vst.sshfl [vmem:[#allocation5] sm:$0x33 pattern:$0x76325410] %v31_v7 }
  0x1d   :  { %92 = shalt.err (!%p89_p12)
}
  0x1e   :  { %s93_s22 = scalar_lea.hbm %s144_s1, 64 }
  0x1f   :  { %p94_p13 = scmp.ne.s32.totalorder %s144_s1, %s93_s22  ;;  %p97_p0 = scmp.lt.u32.totalorder %s93_s22, %s144_s1 }
  0x21   :  { %p99_p1 = pnand %p97_p0, %p94_p13 }
  0x23   :  { %102 = shalt.err (!%p99_p1)
}
  0x24   :  { %50 = dma.vmem_to_hbm [thread:$0]  %s48_s19, 64, %s144_s1, [#allocation4]  }
  0x25   :  { %105 = dma.done.wait [#allocation4], 64  }
  0x26   :  { %106 = vsyncadd [#allocation4], 4294967232 }
  0x27   :  { %54 = vsyncpa [#allocation3], 1 }
  0x28   :  { %55 = vsyncpa [#allocation4], 1 }

</bundles_post_ra>
